<compile_context>
chip_gen: v7x
topology: tpu7x:2x2x1
jax: 0.10.0
libtpu: 0.0.40
codegen_flags: <defaults>
</compile_context>

<pallas_src>
import functools

import jax
import jax.numpy as jnp
from jax import lax
from jax.experimental import pallas as pl
from jax.experimental.pallas import tpu as pltpu

BN_EPS = 1e-5


def _round_up(n, m):
    return ((n + m - 1) // m) * m


def _vmem_capacity_bytes():
    try:
        return int(pltpu.get_tpu_info().vmem_capacity_bytes)
    except Exception:
        return 64 * 1024 * 1024   # conservative default (v7x per-TC VMEM)


def _calibration_tail_kernel(
    x_ref,       # (TB, 32)  f32   input tile in its native HBM layout
    w_ref,       # (16, 48)  f32   [ W1 (16,32) | W2 (16,16) ]
    v_ref,       # (16, 6)   f32   cols: gamma1, beta1, gamma2, beta2, w3, b3
    o_ref,       # (1, TB)   f32   output tile (lane-dense, written on pass 2)
    h1c_ref,     # (n_tiles, 16, TB) bf16  fc1-activation cache (cache mode)
    sum1_ref, ssq1_ref, sum2_ref, ssq2_ref,   # (16, 1) f32 VMEM scratch
    *, batch, tile_b, n_tiles, cache_h1,
):
    p = pl.program_id(0)   # pass: 0 = BN1 stats, 1 = BN2 stats, 2 = emit
    j = pl.program_id(1)   # batch tile index

    @pl.when(jnp.logical_and(p == 0, j == 0))
    def _init_stats():
        sum1_ref[...] = jnp.zeros_like(sum1_ref)
        ssq1_ref[...] = jnp.zeros_like(ssq1_ref)
        sum2_ref[...] = jnp.zeros_like(sum2_ref)
        ssq2_ref[...] = jnp.zeros_like(ssq2_ref)

    w1 = w_ref[:, 0:32]                                           # (16, 32)
    w2 = w_ref[:, 32:48]                                          # (16, 16)
    g1, be1 = v_ref[:, 0:1], v_ref[:, 1:2]                        # (16, 1)
    g2, be2 = v_ref[:, 2:3], v_ref[:, 3:4]
    w3 = v_ref[:, 4:5]                                            # (16, 1)
    b3 = v_ref[0:1, 5:6]                                          # (1, 1)
    inv_n = jnp.float32(1.0 / batch)

    ragged = (batch % tile_b) != 0      # static: only the last tile is partial

    def accum(sum_ref, ssq_ref, h):
        sum_ref[...] += jnp.sum(h, axis=1, keepdims=True)
        ssq_ref[...] += jnp.sum(h * h, axis=1, keepdims=True)

    def accum_masked(sum_ref, ssq_ref, h):
        # Out-of-batch columns of a partial block hold unspecified data; zero
        # them with a select before the reductions -- but only on that tile.
        if not ragged:
            accum(sum_ref, ssq_ref, h)
            return
        last = n_tiles - 1

        @pl.when(j == last)
        def _tail():
            col = lax.broadcasted_iota(jnp.int32, (1, tile_b), 1)
            valid = col < (batch - last * tile_b)
            accum(sum_ref, ssq_ref, jnp.where(valid, h, 0.0))

        @pl.when(j != last)
        def _full():
            accum(sum_ref, ssq_ref, h)

    def fc1():
        # (16,32) x (TB,32) contracted over the feature dim of both -> (16,TB).
        # "NT" MXU matmul (like q @ k.T in flash attention); the transpose
        # rides the matmul path, so no wrapper-side transpose pass over x.
        return lax.dot_general(
            w1, x_ref[...], (((1,), (1,)), ((), ())),
            preferred_element_type=jnp.float32)

    @pl.when(p == 0)
    def _pass0():
        h1 = fc1()
        if cache_h1:
            h1b = h1.astype(jnp.bfloat16)
            h1c_ref[j] = h1b
            h1 = h1b.astype(jnp.float32)  # stats consistent with cached values
        accum_masked(sum1_ref, ssq1_ref, h1)

    @pl.when(p >= 1)
    def _pass12():
        if cache_h1:
            h1 = h1c_ref[j].astype(jnp.float32)   # no HBM read, no fc1 redo
        else:
            h1 = fc1()                            # fallback: re-stream x
        mean1 = sum1_ref[...] * inv_n
        var1 = ssq1_ref[...] * inv_n - mean1 * mean1
        scale1 = g1 * lax.rsqrt(var1 + BN_EPS)
        shift1 = be1 - mean1 * scale1
        a1 = jnp.maximum(h1 * scale1 + shift1, 0.0)               # bn1 + relu
        h2 = jnp.dot(w2, a1, preferred_element_type=jnp.float32)  # (16, TB)

        @pl.when(p == 1)
        def _pass1():
            accum_masked(sum2_ref, ssq2_ref, h2)

        @pl.when(p == 2)
        def _pass2():
            mean2 = sum2_ref[...] * inv_n
            var2 = ssq2_ref[...] * inv_n - mean2 * mean2
            scale2 = g2 * lax.rsqrt(var2 + BN_EPS)
            shift2 = be2 - mean2 * scale2
            a2 = jnp.maximum(h2 * scale2 + shift2, 0.0)           # bn2 + relu
            # fc3 (N=1): VPU multiply + sublane reduce, kept off the MXU.
            out = jnp.sum(a2 * w3, axis=0, keepdims=True) + b3    # (1, TB)
            o_ref[...] = out.astype(o_ref.dtype)


@functools.partial(jax.jit, static_argnames=("max_tile_b", "h1_cache_limit_bytes"))
def calibration_tail(x, params, *, max_tile_b=None, h1_cache_limit_bytes=None):
    """x: (B, 32) float32 -> (B, 1) float32 (PyTorch train-mode forward)."""
    (w1, b1, g1, be1, w2, b2, g2, be2, w3, b3) = params
    del b1, b2  # a Linear bias immediately followed by train-mode BN cancels

    batch, feat = x.shape
    assert feat == 32

    vmem_cap = _vmem_capacity_bytes()
    if max_tile_b is None:
        # The x double buffer costs <= ~1 KiB/sample of VMEM worst case (32
        # lanes padded to 128); keep it near vmem_cap/8.
        max_tile_b = 8192 if vmem_cap <= (64 << 20) else 16384
    if h1_cache_limit_bytes is None:
        h1_cache_limit_bytes = vmem_cap // 4

    tile_b = min(max_tile_b, _round_up(batch, 128))
    n_tiles = pl.cdiv(batch, tile_b)

    # fc1-activation cache: 32 B/sample of VMEM.  Fall back to re-streaming x
    # and recomputing fc1 on every pass if it does not fit.
    cache_h1 = (n_tiles * tile_b * 16 * 2) <= h1_cache_limit_bytes
    cache_shape = (n_tiles, 16, tile_b) if cache_h1 else (1, 16, 128)

    if cache_h1:
        # Pass 0 streams x tile-by-tile; passes 1/2 pin the index so Pallas
        # never re-fetches x from HBM (they read the VMEM h1 cache instead).
        x_index = lambda p, j: (jnp.where(p == 0, j, n_tiles - 1), 0)
    else:
        x_index = lambda p, j: (j, 0)
    # Output blocks are only produced (and written back) on pass 2; on the
    # stats passes the index stays pinned on block 0 and the kernel never
    # touches it, so there is no dummy writeback.
    out_index = lambda p, j: (0, jnp.where(p == 2, j, 0))

    kernel = functools.partial(
        _calibration_tail_kernel,
        batch=batch, tile_b=tile_b, n_tiles=n_tiles, cache_h1=cache_h1)

    # Pack the tiny parameters into two slabs (2 param DMAs instead of 10).
    w_slab = jnp.concatenate([w1, w2], axis=1).astype(jnp.float32)        # (16, 48)
    v_slab = jnp.stack(
        [g1, be1, g2, be2, w3.reshape(16),
         jnp.broadcast_to(b3.reshape(1), (16,))],
        axis=1,
    ).astype(jnp.float32)                                                 # (16, 6)

    out = pl.pallas_call(
        kernel,
        out_shape=jax.ShapeDtypeStruct((1, batch), jnp.float32),
        grid_spec=pltpu.PrefetchScalarGridSpec(
            num_scalar_prefetch=0,
            grid=(3, n_tiles),                       # (pass, batch tile)
            in_specs=[
                pl.BlockSpec((tile_b, 32), x_index),
                pl.BlockSpec((16, 48), lambda p, j: (0, 0)),
                pl.BlockSpec((16, 6), lambda p, j: (0, 0)),
            ],
            out_specs=pl.BlockSpec((1, tile_b), out_index),
            scratch_shapes=[pltpu.VMEM(cache_shape, jnp.bfloat16)]
                         + [pltpu.VMEM((16, 1), jnp.float32)] * 4,
        ),
        compiler_params=pltpu.CompilerParams(
            # Both axes must stay "arbitrary": BN statistics and the h1 cache
            # are carried across grid steps in VMEM scratch.
            dimension_semantics=("arbitrary", "arbitrary"),
            vmem_limit_bytes=min(vmem_cap * 3 // 4, 112 * 1024 * 1024),
        ),
    )(x.astype(jnp.float32), w_slab, v_slab)

    return out.reshape(batch, 1)


def init_params(key):
    """PyTorch-layout parameters: Linear weights are (out_features, in_features)."""
    k1, k2, k3, k4, k5, k6, k7, k8, k9, k10 = jax.random.split(key, 10)
    w1 = jax.random.normal(k1, (16, 32), jnp.float32) * 0.1
    b1 = jax.random.normal(k2, (16,), jnp.float32) * 0.1
    g1 = 1.0 + 0.1 * jax.random.normal(k3, (16,), jnp.float32)
    be1 = 0.1 * jax.random.normal(k4, (16,), jnp.float32)
    w2 = jax.random.normal(k5, (16, 16), jnp.float32) * 0.1
    b2 = jax.random.normal(k6, (16,), jnp.float32) * 0.1
    g2 = 1.0 + 0.1 * jax.random.normal(k7, (16,), jnp.float32)
    be2 = 0.1 * jax.random.normal(k8, (16,), jnp.float32)
    w3 = jax.random.normal(k9, (1, 16), jnp.float32) * 0.1
    b3 = jax.random.normal(k10, (1,), jnp.float32) * 0.1
    return (w1, b1, g1, be1, w2, b2, g2, be2, w3, b3)


def reference(x, params):
    """Pure-f32 JAX reference with full PyTorch train-mode semantics."""
    w1, b1, g1, be1, w2, b2, g2, be2, w3, b3 = params
    h = x @ w1.T + b1
    m = h.mean(0)
    v = ((h - m) ** 2).mean(0)
    h = jnp.maximum((h - m) / jnp.sqrt(v + BN_EPS) * g1 + be1, 0.0)
    h = h @ w2.T + b2
    m = h.mean(0)
    v = ((h - m) ** 2).mean(0)
    h = jnp.maximum((h - m) / jnp.sqrt(v + BN_EPS) * g2 + be2, 0.0)
    return h @ w3.T + b3


if __name__ == "__main__":
    key = jax.random.PRNGKey(0)
    kp, k1, k2, k3 = jax.random.split(key, 4)
    params = init_params(kp)

    # Tolerance is dominated by the bf16 fc1-activation cache (and MXU f32
    # matmul precision); the exact bias-under-BN cancellation is error-free.
    def check(x, **kw):
        out = jax.block_until_ready(calibration_tail(x, params, **kw))
        ref = reference(x, params)
        assert out.shape == (x.shape[0], 1), out.shape
        err = float(jnp.max(jnp.abs(out - ref)))
        assert jnp.allclose(out, ref, atol=1e-2, rtol=1e-2), f"max abs err {err}"

    # Small batch: single partial tile (exercises the tail mask and the
    # OOB-dropped output writes of the partial block).
    check(jax.random.normal(k1, (96, 32), jnp.float32))

    # Ragged multi-tile batch with a small forced tile: exercises streaming BN
    # stats, the VMEM h1 cache and the pinned (no-refetch) x / out index maps.
    check(jax.random.normal(k2, (777, 32), jnp.float32), max_tile_b=256)

    # Aligned multi-tile batch with the h1 cache disabled: exercises the
    # recompute-from-x fallback and the unmasked static stats path.
    check(jax.random.normal(k3, (768, 32), jnp.float32), max_tile_b=256,
          h1_cache_limit_bytes=0)

    print("KERNEL_OK")
</pallas_src>

<mosaic_0001>
module attributes {stable_mosaic.version = 11 : i64} {
  func.func @_calibration_tail_kernel(%arg0: i32, %arg1: i32, %arg2: memref<128x32xf32, #tpu.memory_space<vmem>>, %arg3: memref<16x48xf32, #tpu.memory_space<vmem>>, %arg4: memref<16x6xf32, #tpu.memory_space<vmem>>, %arg5: memref<1x128xf32, #tpu.memory_space<vmem>>, %arg6: memref<1x16x128xbf16, #tpu.memory_space<vmem>>, %arg7: memref<16x1xf32, #tpu.memory_space<vmem>>, %arg8: memref<16x1xf32, #tpu.memory_space<vmem>>, %arg9: memref<16x1xf32, #tpu.memory_space<vmem>>, %arg10: memref<16x1xf32, #tpu.memory_space<vmem>>) attributes {dimension_semantics = [#tpu.dimension_semantics<arbitrary>, #tpu.dimension_semantics<arbitrary>], iteration_bounds = array<i64: 3, 1>, scalar_prefetch = 0 : i64, scratch_operands = 5 : i64, tpu.core_type = #tpu.core_type<tc>, window_params = [{transform_indices = @transform_0, window_bounds = array<i64: 128, 32>}, {pipeline_mode = #tpu.pipeline_mode<synchronous>, transform_indices = @transform_1, window_bounds = array<i64: 16, 48>}, {pipeline_mode = #tpu.pipeline_mode<synchronous>, transform_indices = @transform_2, window_bounds = array<i64: 16, 6>}, {transform_indices = @transform_3, window_bounds = array<i64: 1, 128>}]} {
    %c0_i32 = arith.constant 0 : i32
    %0 = arith.cmpi eq, %arg0, %c0_i32 : i32
    %c0_i32_0 = arith.constant 0 : i32
    %1 = arith.cmpi eq, %arg1, %c0_i32_0 : i32
    %2 = arith.andi %0, %1 : i1
    %3 = arith.extui %2 : i1 to i32
    %c0_i32_1 = arith.constant 0 : i32
    %4 = arith.cmpi ne, %3, %c0_i32_1 : i32
    scf.if %4 {
      %cst_14 = arith.constant 0.000000e+00 : f32
      %19 = vector.broadcast %cst_14 : f32 to vector<16x1xf32>
      %c0_15 = arith.constant 0 : index
      %c0_16 = arith.constant 0 : index
      %20 = vector.load %arg7[%c0_15, %c0_16] : memref<16x1xf32, #tpu.memory_space<vmem>>, vector<16x1xf32>
      tpu.vector_store %arg7[%c0_15, %c0_16], %19 {strides = array<i32>} : memref<16x1xf32, #tpu.memory_space<vmem>>, vector<16x1xf32>,
      %cst_17 = arith.constant 0.000000e+00 : f32
      %21 = vector.broadcast %cst_17 : f32 to vector<16x1xf32>
      %c0_18 = arith.constant 0 : index
      %c0_19 = arith.constant 0 : index
      %22 = vector.load %arg8[%c0_18, %c0_19] : memref<16x1xf32, #tpu.memory_space<vmem>>, vector<16x1xf32>
      tpu.vector_store %arg8[%c0_18, %c0_19], %21 {strides = array<i32>} : memref<16x1xf32, #tpu.memory_space<vmem>>, vector<16x1xf32>,
      %cst_20 = arith.constant 0.000000e+00 : f32
      %23 = vector.broadcast %cst_20 : f32 to vector<16x1xf32>
      %c0_21 = arith.constant 0 : index
      %c0_22 = arith.constant 0 : index
      %24 = vector.load %arg9[%c0_21, %c0_22] : memref<16x1xf32, #tpu.memory_space<vmem>>, vector<16x1xf32>
      tpu.vector_store %arg9[%c0_21, %c0_22], %23 {strides = array<i32>} : memref<16x1xf32, #tpu.memory_space<vmem>>, vector<16x1xf32>,
      %cst_23 = arith.constant 0.000000e+00 : f32
      %25 = vector.broadcast %cst_23 : f32 to vector<16x1xf32>
      %c0_24 = arith.constant 0 : index
      %c0_25 = arith.constant 0 : index
      %26 = vector.load %arg10[%c0_24, %c0_25] : memref<16x1xf32, #tpu.memory_space<vmem>>, vector<16x1xf32>
      tpu.vector_store %arg10[%c0_24, %c0_25], %25 {strides = array<i32>} : memref<16x1xf32, #tpu.memory_space<vmem>>, vector<16x1xf32>,
    } else {
    }
    %c0 = arith.constant 0 : index
    %c0_2 = arith.constant 0 : index
    %5 = vector.load %arg3[%c0, %c0_2] : memref<16x48xf32, #tpu.memory_space<vmem>>, vector<16x32xf32>
    %c0_3 = arith.constant 0 : index
    %c32 = arith.constant 32 : index
    %6 = vector.load %arg3[%c0_3, %c32] : memref<16x48xf32, #tpu.memory_space<vmem>>, vector<16x16xf32>
    %c0_4 = arith.constant 0 : index
    %c0_5 = arith.constant 0 : index
    %7 = vector.load %arg4[%c0_4, %c0_5] : memref<16x6xf32, #tpu.memory_space<vmem>>, vector<16x1xf32>
    %c0_6 = arith.constant 0 : index
    %c1 = arith.constant 1 : index
    %8 = vector.load %arg4[%c0_6, %c1] : memref<16x6xf32, #tpu.memory_space<vmem>>, vector<16x1xf32>
    %c0_7 = arith.constant 0 : index
    %c2 = arith.constant 2 : index
    %9 = vector.load %arg4[%c0_7, %c2] : memref<16x6xf32, #tpu.memory_space<vmem>>, vector<16x1xf32>
    %c0_8 = arith.constant 0 : index
    %c3 = arith.constant 3 : index
    %10 = vector.load %arg4[%c0_8, %c3] : memref<16x6xf32, #tpu.memory_space<vmem>>, vector<16x1xf32>
    %c0_9 = arith.constant 0 : index
    %c4 = arith.constant 4 : index
    %11 = vector.load %arg4[%c0_9, %c4] : memref<16x6xf32, #tpu.memory_space<vmem>>, vector<16x1xf32>
    %c0_10 = arith.constant 0 : index
    %c5 = arith.constant 5 : index
    %12 = vector.load %arg4[%c0_10, %c5] : memref<16x6xf32, #tpu.memory_space<vmem>>, vector<1x1xf32>
    %c0_i32_11 = arith.constant 0 : i32
    %13 = arith.cmpi eq, %arg0, %c0_i32_11 : i32
    %14 = arith.extui %13 : i1 to i32
    %c0_i32_12 = arith.constant 0 : i32
    %15 = arith.cmpi ne, %14, %c0_i32_12 : i32
    scf.if %15 {
      %c0_14 = arith.constant 0 : index
      %c0_15 = arith.constant 0 : index
      %19 = vector.load %arg2[%c0_14, %c0_15] : memref<128x32xf32, #tpu.memory_space<vmem>>, vector<128x32xf32>
      %cst_16 = arith.constant dense<0.000000e+00> : vector<16x128xf32>
      %20 = tpu.matmul %5, %19, %cst_16 {dimension_numbers = #tpu.dot_dimension_numbers<[1], [1], [0], [0], [0, 0, 1, 0], [], []>} : vector<16x32xf32>, vector<128x32xf32>, vector<16x128xf32> -> vector<16x128xf32>
      %21 = arith.truncf %20 : vector<16x128xf32> to vector<16x128xbf16>
      %22 = arith.index_cast %arg1 : i32 to index
      %c0_17 = arith.constant 0 : index
      %c0_18 = arith.constant 0 : index
      %23 = vector.load %arg6[%22, %c0_17, %c0_18] : memref<1x16x128xbf16, #tpu.memory_space<vmem>>, vector<1x16x128xbf16>
      %24 = vector.shape_cast %23 : vector<1x16x128xbf16> to vector<16x128xbf16>
      %25 = vector.shape_cast %21 : vector<16x128xbf16> to vector<1x16x128xbf16>
      tpu.vector_store %arg6[%22, %c0_17, %c0_18], %25 {strides = array<i32>} : memref<1x16x128xbf16, #tpu.memory_space<vmem>>, vector<1x16x128xbf16>,
      %26 = arith.extf %21 : vector<16x128xbf16> to vector<16x128xf32>
      %c0_i32_19 = arith.constant 0 : i32
      %27 = arith.cmpi eq, %arg1, %c0_i32_19 : i32
      %28 = arith.extui %27 : i1 to i32
      %c0_i32_20 = arith.constant 0 : i32
      %29 = arith.cmpi ne, %28, %c0_i32_20 : i32
      scf.if %29 {
        %33 = tpu.iota {dimensions = array<i32: 1>} : vector<1x128xi32>
        %c96_i32 = arith.constant 96 : i32
        %34 = vector.broadcast %c96_i32 : i32 to vector<1x128xi32>
        %35 = arith.cmpi slt, %33, %34 : vector<1x128xi32>
        %cst_23 = arith.constant 0.000000e+00 : f32
        %36 = vector.shape_cast %35 : vector<1x128xi1> to vector<1x128xi1>
        %37 = vector.broadcast %36 : vector<1x128xi1> to vector<16x128xi1>
        %38 = vector.broadcast %cst_23 : f32 to vector<16x128xf32>
        %39 = arith.select %37, %26, %38 : vector<16x128xi1>, vector<16x128xf32>
        %c0_24 = arith.constant 0 : index
        %c0_25 = arith.constant 0 : index
        %40 = vector.load %arg7[%c0_24, %c0_25] : memref<16x1xf32, #tpu.memory_space<vmem>>, vector<16x1xf32>
        %cst_26 = arith.constant dense<0.000000e+00> : vector<16xf32>
        %41 = vector.multi_reduction <add>, %39, %cst_26 [1] : vector<16x128xf32> to vector<16xf32>
        %42 = vector.shape_cast %41 : vector<16xf32> to vector<16x1xf32>
        %43 = arith.addf %40, %42 : vector<16x1xf32>
        %c0_27 = arith.constant 0 : index
        %c0_28 = arith.constant 0 : index
        %44 = vector.load %arg7[%c0_27, %c0_28] : memref<16x1xf32, #tpu.memory_space<vmem>>, vector<16x1xf32>
        tpu.vector_store %arg7[%c0_27, %c0_28], %43 {strides = array<i32>} : memref<16x1xf32, #tpu.memory_space<vmem>>, vector<16x1xf32>,
        %c0_29 = arith.constant 0 : index
        %c0_30 = arith.constant 0 : index
        %45 = vector.load %arg8[%c0_29, %c0_30] : memref<16x1xf32, #tpu.memory_space<vmem>>, vector<16x1xf32>
        %46 = arith.mulf %39, %39 : vector<16x128xf32>
        %cst_31 = arith.constant dense<0.000000e+00> : vector<16xf32>
        %47 = vector.multi_reduction <add>, %46, %cst_31 [1] : vector<16x128xf32> to vector<16xf32>
        %48 = vector.shape_cast %47 : vector<16xf32> to vector<16x1xf32>
        %49 = arith.addf %45, %48 : vector<16x1xf32>
        %c0_32 = arith.constant 0 : index
        %c0_33 = arith.constant 0 : index
        %50 = vector.load %arg8[%c0_32, %c0_33] : memref<16x1xf32, #tpu.memory_space<vmem>>, vector<16x1xf32>
        tpu.vector_store %arg8[%c0_32, %c0_33], %49 {strides = array<i32>} : memref<16x1xf32, #tpu.memory_space<vmem>>, vector<16x1xf32>,
      } else {
      }
      %c0_i32_21 = arith.constant 0 : i32
      %30 = arith.cmpi ne, %arg1, %c0_i32_21 : i32
      %31 = arith.extui %30 : i1 to i32
      %c0_i32_22 = arith.constant 0 : i32
      %32 = arith.cmpi ne, %31, %c0_i32_22 : i32
      scf.if %32 {
        %c0_23 = arith.constant 0 : index
        %c0_24 = arith.constant 0 : index
        %33 = vector.load %arg7[%c0_23, %c0_24] : memref<16x1xf32, #tpu.memory_space<vmem>>, vector<16x1xf32>
        %cst_25 = arith.constant dense<0.000000e+00> : vector<16xf32>
        %34 = vector.multi_reduction <add>, %26, %cst_25 [1] : vector<16x128xf32> to vector<16xf32>
        %35 = vector.shape_cast %34 : vector<16xf32> to vector<16x1xf32>
        %36 = arith.addf %33, %35 : vector<16x1xf32>
        %c0_26 = arith.constant 0 : index
        %c0_27 = arith.constant 0 : index
        %37 = vector.load %arg7[%c0_26, %c0_27] : memref<16x1xf32, #tpu.memory_space<vmem>>, vector<16x1xf32>
        tpu.vector_store %arg7[%c0_26, %c0_27], %36 {strides = array<i32>} : memref<16x1xf32, #tpu.memory_space<vmem>>, vector<16x1xf32>,
        %c0_28 = arith.constant 0 : index
        %c0_29 = arith.constant 0 : index
        %38 = vector.load %arg8[%c0_28, %c0_29] : memref<16x1xf32, #tpu.memory_space<vmem>>, vector<16x1xf32>
        %39 = arith.mulf %26, %26 : vector<16x128xf32>
        %cst_30 = arith.constant dense<0.000000e+00> : vector<16xf32>
        %40 = vector.multi_reduction <add>, %39, %cst_30 [1] : vector<16x128xf32> to vector<16xf32>
        %41 = vector.shape_cast %40 : vector<16xf32> to vector<16x1xf32>
        %42 = arith.addf %38, %41 : vector<16x1xf32>
        %c0_31 = arith.constant 0 : index
        %c0_32 = arith.constant 0 : index
        %43 = vector.load %arg8[%c0_31, %c0_32] : memref<16x1xf32, #tpu.memory_space<vmem>>, vector<16x1xf32>
        tpu.vector_store %arg8[%c0_31, %c0_32], %42 {strides = array<i32>} : memref<16x1xf32, #tpu.memory_space<vmem>>, vector<16x1xf32>,
      } else {
      }
    } else {
    }
    %c1_i32 = arith.constant 1 : i32
    %16 = arith.cmpi sge, %arg0, %c1_i32 : i32
    %17 = arith.extui %16 : i1 to i32
    %cst = arith.constant 0.010416667 : f32
    %c0_i32_13 = arith.constant 0 : i32
    %18 = arith.cmpi ne, %17, %c0_i32_13 : i32
    scf.if %18 {
      %19 = arith.index_cast %arg1 : i32 to index
      %c0_14 = arith.constant 0 : index
      %c0_15 = arith.constant 0 : index
      %20 = vector.load %arg6[%19, %c0_14, %c0_15] : memref<1x16x128xbf16, #tpu.memory_space<vmem>>, vector<1x16x128xbf16>
      %21 = vector.shape_cast %20 : vector<1x16x128xbf16> to vector<16x128xbf16>
      %22 = arith.extf %21 : vector<16x128xbf16> to vector<16x128xf32>
      %c0_16 = arith.constant 0 : index
      %c0_17 = arith.constant 0 : index
      %23 = vector.load %arg7[%c0_16, %c0_17] : memref<16x1xf32, #tpu.memory_space<vmem>>, vector<16x1xf32>
      %24 = vector.broadcast %cst : f32 to vector<16x1xf32>
      %25 = arith.mulf %23, %24 : vector<16x1xf32>
      %c0_18 = arith.constant 0 : index
      %c0_19 = arith.constant 0 : index
      %26 = vector.load %arg8[%c0_18, %c0_19] : memref<16x1xf32, #tpu.memory_space<vmem>>, vector<16x1xf32>
      %27 = vector.broadcast %cst : f32 to vector<16x1xf32>
      %28 = arith.mulf %26, %27 : vector<16x1xf32>
      %29 = arith.mulf %25, %25 : vector<16x1xf32>
      %30 = arith.subf %28, %29 : vector<16x1xf32>
      %cst_20 = arith.constant 9.99999974E-6 : f32
      %31 = vector.broadcast %cst_20 : f32 to vector<16x1xf32>
      %32 = arith.addf %30, %31 : vector<16x1xf32>
      %33 = math.rsqrt %32 : vector<16x1xf32>
      %34 = arith.mulf %7, %33 : vector<16x1xf32>
      %35 = arith.mulf %25, %34 : vector<16x1xf32>
      %36 = arith.subf %8, %35 : vector<16x1xf32>
      %37 = vector.broadcast %34 : vector<16x1xf32> to vector<16x128xf32>
      %38 = arith.mulf %22, %37 : vector<16x128xf32>
      %39 = vector.broadcast %36 : vector<16x1xf32> to vector<16x128xf32>
      %40 = arith.addf %38, %39 : vector<16x128xf32>
      %cst_21 = arith.constant 0.000000e+00 : f32
      %41 = vector.broadcast %cst_21 : f32 to vector<16x128xf32>
      %42 = arith.maximumf %40, %41 : vector<16x128xf32>
      %cst_22 = arith.constant dense<0.000000e+00> : vector<16x128xf32>
      %43 = tpu.matmul %6, %42, %cst_22 {dimension_numbers = #tpu.dot_dimension_numbers<[1], [0], [0], [1], [0, 0, 1, 1], [], []>} : vector<16x16xf32>, vector<16x128xf32>, vector<16x128xf32> -> vector<16x128xf32>
      %c1_i32_23 = arith.constant 1 : i32
      %44 = arith.cmpi eq, %arg0, %c1_i32_23 : i32
      %45 = arith.extui %44 : i1 to i32
      %c0_i32_24 = arith.constant 0 : i32
      %46 = arith.cmpi ne, %45, %c0_i32_24 : i32
      scf.if %46 {
        %c0_i32_26 = arith.constant 0 : i32
        %50 = arith.cmpi eq, %arg1, %c0_i32_26 : i32
        %51 = arith.extui %50 : i1 to i32
        %c0_i32_27 = arith.constant 0 : i32
        %52 = arith.cmpi ne, %51, %c0_i32_27 : i32
        scf.if %52 {
          %56 = tpu.iota {dimensions = array<i32: 1>} : vector<1x128xi32>
          %c96_i32 = arith.constant 96 : i32
          %57 = vector.broadcast %c96_i32 : i32 to vector<1x128xi32>
          %58 = arith.cmpi slt, %56, %57 : vector<1x128xi32>
          %cst_30 = arith.constant 0.000000e+00 : f32
          %59 = vector.shape_cast %58 : vector<1x128xi1> to vector<1x128xi1>
          %60 = vector.broadcast %59 : vector<1x128xi1> to vector<16x128xi1>
          %61 = vector.broadcast %cst_30 : f32 to vector<16x128xf32>
          %62 = arith.select %60, %43, %61 : vector<16x128xi1>, vector<16x128xf32>
          %c0_31 = arith.constant 0 : index
          %c0_32 = arith.constant 0 : index
          %63 = vector.load %arg9[%c0_31, %c0_32] : memref<16x1xf32, #tpu.memory_space<vmem>>, vector<16x1xf32>
          %cst_33 = arith.constant dense<0.000000e+00> : vector<16xf32>
          %64 = vector.multi_reduction <add>, %62, %cst_33 [1] : vector<16x128xf32> to vector<16xf32>
          %65 = vector.shape_cast %64 : vector<16xf32> to vector<16x1xf32>
          %66 = arith.addf %63, %65 : vector<16x1xf32>
          %c0_34 = arith.constant 0 : index
          %c0_35 = arith.constant 0 : index
          %67 = vector.load %arg9[%c0_34, %c0_35] : memref<16x1xf32, #tpu.memory_space<vmem>>, vector<16x1xf32>
          tpu.vector_store %arg9[%c0_34, %c0_35], %66 {strides = array<i32>} : memref<16x1xf32, #tpu.memory_space<vmem>>, vector<16x1xf32>,
          %c0_36 = arith.constant 0 : index
          %c0_37 = arith.constant 0 : index
          %68 = vector.load %arg10[%c0_36, %c0_37] : memref<16x1xf32, #tpu.memory_space<vmem>>, vector<16x1xf32>
          %69 = arith.mulf %62, %62 : vector<16x128xf32>
          %cst_38 = arith.constant dense<0.000000e+00> : vector<16xf32>
          %70 = vector.multi_reduction <add>, %69, %cst_38 [1] : vector<16x128xf32> to vector<16xf32>
          %71 = vector.shape_cast %70 : vector<16xf32> to vector<16x1xf32>
          %72 = arith.addf %68, %71 : vector<16x1xf32>
          %c0_39 = arith.constant 0 : index
          %c0_40 = arith.constant 0 : index
          %73 = vector.load %arg10[%c0_39, %c0_40] : memref<16x1xf32, #tpu.memory_space<vmem>>, vector<16x1xf32>
          tpu.vector_store %arg10[%c0_39, %c0_40], %72 {strides = array<i32>} : memref<16x1xf32, #tpu.memory_space<vmem>>, vector<16x1xf32>,
        } else {
        }
        %c0_i32_28 = arith.constant 0 : i32
        %53 = arith.cmpi ne, %arg1, %c0_i32_28 : i32
        %54 = arith.extui %53 : i1 to i32
        %c0_i32_29 = arith.constant 0 : i32
        %55 = arith.cmpi ne, %54, %c0_i32_29 : i32
        scf.if %55 {
          %c0_30 = arith.constant 0 : index
          %c0_31 = arith.constant 0 : index
          %56 = vector.load %arg9[%c0_30, %c0_31] : memref<16x1xf32, #tpu.memory_space<vmem>>, vector<16x1xf32>
          %cst_32 = arith.constant dense<0.000000e+00> : vector<16xf32>
          %57 = vector.multi_reduction <add>, %43, %cst_32 [1] : vector<16x128xf32> to vector<16xf32>
          %58 = vector.shape_cast %57 : vector<16xf32> to vector<16x1xf32>
          %59 = arith.addf %56, %58 : vector<16x1xf32>
          %c0_33 = arith.constant 0 : index
          %c0_34 = arith.constant 0 : index
          %60 = vector.load %arg9[%c0_33, %c0_34] : memref<16x1xf32, #tpu.memory_space<vmem>>, vector<16x1xf32>
          tpu.vector_store %arg9[%c0_33, %c0_34], %59 {strides = array<i32>} : memref<16x1xf32, #tpu.memory_space<vmem>>, vector<16x1xf32>,
          %c0_35 = arith.constant 0 : index
          %c0_36 = arith.constant 0 : index
          %61 = vector.load %arg10[%c0_35, %c0_36] : memref<16x1xf32, #tpu.memory_space<vmem>>, vector<16x1xf32>
          %62 = arith.mulf %43, %43 : vector<16x128xf32>
          %cst_37 = arith.constant dense<0.000000e+00> : vector<16xf32>
          %63 = vector.multi_reduction <add>, %62, %cst_37 [1] : vector<16x128xf32> to vector<16xf32>
          %64 = vector.shape_cast %63 : vector<16xf32> to vector<16x1xf32>
          %65 = arith.addf %61, %64 : vector<16x1xf32>
          %c0_38 = arith.constant 0 : index
          %c0_39 = arith.constant 0 : index
          %66 = vector.load %arg10[%c0_38, %c0_39] : memref<16x1xf32, #tpu.memory_space<vmem>>, vector<16x1xf32>
          tpu.vector_store %arg10[%c0_38, %c0_39], %65 {strides = array<i32>} : memref<16x1xf32, #tpu.memory_space<vmem>>, vector<16x1xf32>,
        } else {
        }
      } else {
      }
      %c2_i32 = arith.constant 2 : i32
      %47 = arith.cmpi eq, %arg0, %c2_i32 : i32
      %48 = arith.extui %47 : i1 to i32
      %c0_i32_25 = arith.constant 0 : i32
      %49 = arith.cmpi ne, %48, %c0_i32_25 : i32
      scf.if %49 {
        %c0_26 = arith.constant 0 : index
        %c0_27 = arith.constant 0 : index
        %50 = vector.load %arg9[%c0_26, %c0_27] : memref<16x1xf32, #tpu.memory_space<vmem>>, vector<16x1xf32>
        %51 = vector.broadcast %cst : f32 to vector<16x1xf32>
        %52 = arith.mulf %50, %51 : vector<16x1xf32>
        %c0_28 = arith.constant 0 : index
        %c0_29 = arith.constant 0 : index
        %53 = vector.load %arg10[%c0_28, %c0_29] : memref<16x1xf32, #tpu.memory_space<vmem>>, vector<16x1xf32>
        %54 = vector.broadcast %cst : f32 to vector<16x1xf32>
        %55 = arith.mulf %53, %54 : vector<16x1xf32>
        %56 = arith.mulf %52, %52 : vector<16x1xf32>
        %57 = arith.subf %55, %56 : vector<16x1xf32>
        %cst_30 = arith.constant 9.99999974E-6 : f32
        %58 = vector.broadcast %cst_30 : f32 to vector<16x1xf32>
        %59 = arith.addf %57, %58 : vector<16x1xf32>
        %60 = math.rsqrt %59 : vector<16x1xf32>
        %61 = arith.mulf %9, %60 : vector<16x1xf32>
        %62 = arith.mulf %52, %61 : vector<16x1xf32>
        %63 = arith.subf %10, %62 : vector<16x1xf32>
        %64 = vector.broadcast %61 : vector<16x1xf32> to vector<16x128xf32>
        %65 = arith.mulf %43, %64 : vector<16x128xf32>
        %66 = vector.broadcast %63 : vector<16x1xf32> to vector<16x128xf32>
        %67 = arith.addf %65, %66 : vector<16x128xf32>
        %cst_31 = arith.constant 0.000000e+00 : f32
        %68 = vector.broadcast %cst_31 : f32 to vector<16x128xf32>
        %69 = arith.maximumf %67, %68 : vector<16x128xf32>
        %70 = vector.broadcast %11 : vector<16x1xf32> to vector<16x128xf32>
        %71 = arith.mulf %69, %70 : vector<16x128xf32>
        %cst_32 = arith.constant dense<0.000000e+00> : vector<128xf32>
        %72 = vector.multi_reduction <add>, %71, %cst_32 [0] : vector<16x128xf32> to vector<128xf32>
        %73 = vector.shape_cast %72 : vector<128xf32> to vector<1x128xf32>
        %74 = vector.broadcast %12 : vector<1x1xf32> to vector<1x128xf32>
        %75 = arith.addf %73, %74 : vector<1x128xf32>
        %c0_33 = arith.constant 0 : index
        %c0_34 = arith.constant 0 : index
        %76 = vector.load %arg5[%c0_33, %c0_34] : memref<1x128xf32, #tpu.memory_space<vmem>>, vector<1x128xf32>
        tpu.vector_store %arg5[%c0_33, %c0_34], %75 {strides = array<i32>} : memref<1x128xf32, #tpu.memory_space<vmem>>, vector<1x128xf32>,
      } else {
      }
    } else {
    }
    return
  }
  func.func @transform_0(%arg0: i32, %arg1: i32) -> (i32, i32) {
    %c0_i32 = arith.constant 0 : i32
    %0 = arith.cmpi eq, %arg0, %c0_i32 : i32
    %c0_i32_0 = arith.constant 0 : i32
    %1 = arith.select %0, %arg1, %c0_i32_0 : i32
    %c0_i32_1 = arith.constant 0 : i32
    %c0_i32_2 = arith.constant 0 : i32
    return %1, %c0_i32_1 : i32, i32
  }
  func.func @transform_1(%arg0: i32, %arg1: i32) -> (i32, i32) {
    %c0_i32 = arith.constant 0 : i32
    %c0_i32_0 = arith.constant 0 : i32
    %c0_i32_1 = arith.constant 0 : i32
    return %c0_i32, %c0_i32_0 : i32, i32
  }
  func.func @transform_2(%arg0: i32, %arg1: i32) -> (i32, i32) {
    %c0_i32 = arith.constant 0 : i32
    %c0_i32_0 = arith.constant 0 : i32
    %c0_i32_1 = arith.constant 0 : i32
    return %c0_i32, %c0_i32_0 : i32, i32
  }
  func.func @transform_3(%arg0: i32, %arg1: i32) -> (i32, i32) {
    %c2_i32 = arith.constant 2 : i32
    %0 = arith.cmpi eq, %arg0, %c2_i32 : i32
    %c0_i32 = arith.constant 0 : i32
    %1 = arith.select %0, %arg1, %c0_i32 : i32
    %c0_i32_0 = arith.constant 0 : i32
    %c0_i32_1 = arith.constant 0 : i32
    return %c0_i32_0, %1 : i32, i32
  }
}

</mosaic_0001>

<bundles_post_ra>
// kernel: calibration_tail.1
= control target key start
LH: loop header
LB: loop body
LE: loop exit
PB: predicated region body
PF: predicated region fallthrough
CT: control target
= control target key end

     0   :  { %8 = vsyncpa [#allocation8], 0  ;;  %s1347_s0 = inlined_call_operand.vmem [shape: f32[96,32], index: 0, kind: input, shape index: {}]   ;;  %s1348_s1 = inlined_call_operand.vmem [shape: f32[16,48], index: 1, kind: input, shape index: {}]   ;;  %s1349_s2 = inlined_call_operand.vmem [shape: f32[16,6], index: 2, kind: input, shape index: {}]   ;;  %s1350_s3 = inlined_call_operand.hbm [shape: f32[1,96], index: 3, kind: output, shape index: {}]  }
   0x1   :  { %10 = vsyncpa [#allocation8 + $0x1], 0  ;;  %s1148_s12 = smov 0   ;;  %s1150_s13 = smov 0  }
   0x2   :  { %s1152_s14 = smov 0  }
   0x3 LB: > { %s844_s15 = sadd.s32 4294967295, %s1113_s14   ;;  %s845_s16 = sadd.s32 4294967294, %s1113_s14   ;;  %s1113_s14 = sphi %s1152_s14, %s16_s14   ;;  %s1109_s13 = sphi %s1150_s13, %s1355_s13   ;;  %s1105_s12 = sphi %s1148_s12, %s1354_s12  }
   0x4   : > { %s28_s17 = sadd.s32 1, %s1109_s13  ;;  %p849_p0 = scmp.ge.s32.totalorder %s1113_s14, 1 }
   0x5   : > { %p30_p1 = scmp.ge.s32.totalorder %s28_s17, 3  ;;  %p169_p2 = scmp.lt.s32.totalorder %s1113_s14, 4 }
   0x7   : > { %s1357_s17 = smov (%p30_p1, %s28_s17), 0  ;;  %p170_p3 = pnand %p849_p0, %p169_p2 }
   0x8   : > { %p212_p4 = scmp.eq.s32.totalorder (!%p170_p3), %s1105_s12, 0 }
   0x9   : > { %173 = sbr.rel (%p170_p3) target bundleno = 1662 (0x67e), region = 32 }
  0x10   : > { %217 = sbr.rel (!%p212_p4) target bundleno = 23 (0x17), region = 36  ;;  %vm218_vm0 = vcmask (%p212_p4), 7168   ;;  %v1115_v0 = vmov (%p212_p4), 0.0  }
  0x11   : > { %219 = vst.msk [vmem:[#allocation3] sm:$0xff] (%p212_p4), %vm218_vm0, %v1115_v0  ;;  %220 = vst.msk [vmem:[#allocation3 + $0x8] sm:$0xff] (%p212_p4), %vm218_vm0, %v1115_v0 }
  0x12   : > { %221 = vst.msk [vmem:[#allocation4] sm:$0xff] (%p212_p4), %vm218_vm0, %v1115_v0  ;;  %222 = vst.msk [vmem:[#allocation4 + $0x8] sm:$0xff] (%p212_p4), %vm218_vm0, %v1115_v0 }
  0x13   : > { %223 = vst.msk [vmem:[#allocation5] sm:$0xff] (%p212_p4), %vm218_vm0, %v1115_v0  ;;  %224 = vst.msk [vmem:[#allocation5 + $0x8] sm:$0xff] (%p212_p4), %vm218_vm0, %v1115_v0 }
  0x14   : > { %225 = vst.msk [vmem:[#allocation6] sm:$0xff] (%p212_p4), %vm218_vm0, %v1115_v0  ;;  %226 = vst.msk [vmem:[#allocation6 + $0x8] sm:$0xff] (%p212_p4), %vm218_vm0, %v1115_v0 }
  0x17 PF: > { %v1174_v1 = vld [vmem:[%s1348_s1] sm:$0xff]  ;;  %v1179_v2 = vld [vmem:[%s1348_s1 + $0x8] sm:$0xff]  ;;  %p851_p5 = scmp.ne.s32.totalorder %s1105_s12, 0 }
  0x18   : > { %v1184_v3 = vld [vmem:[%s1349_s2] sm:$0xff]  ;;  %v1189_v4 = vld [vmem:[%s1349_s2 + $0x8] sm:$0xff]  ;;  %vm251_vm1 = vcmask (!%p851_p5), 261120   ;;  %v237_v8 = vld [vmem:[%s1347_s0 + $0x10] sm:$0xff] (!%p851_p5)  ;;  %v390_v31 = vlaneseq (!%p851_p5)  ;;  %vm405_vm4 = vcmask (!%p851_p5), 7168  }
  0x19   : > { %v1194_v5 = vld [vmem:[%s1349_s2] sm:$0x1]  ;;  %234 = sbr.rel (%p851_p5) target bundleno = 462 (0x1ce), region = 40  ;;  %v236_v7 = vld [vmem:[%s1347_s0 + $0x8] sm:$0xff] (!%p851_p5)  ;;  %vm1208_vm2 = vmpackc.low (!%p851_p5), %vm251_vm1, %vm251_vm1  ;;  %934 = vmatprep.mubr.msk.f32.mxu0 (!%p851_p5), %vm251_vm1, %v1174_v1 }
  0x1a   : > { %v235_v6 = vld [vmem:[%s1347_s0] sm:$0xff] (!%p851_p5)  ;;  %v238_v11 = vld [vmem:[%s1347_s0 + $0x18] sm:$0xff] (!%p851_p5)  ;;  %v240_v14 = vld [vmem:[%s1347_s0 + $0x28] sm:$0xff] (!%p851_p5)  ;;  %v391_v32 = vand.u32 (!%p851_p5), 127, %v390_v31 }
  0x1b   : > { %v944_v9 = vpack.c.bf16 (!%p851_p5), %v236_v7, %v235_v6  ;;  %v950_v12 = vpack.c.bf16 (!%p851_p5), %v238_v11, %v237_v8  ;;  %v239_v13 = vld [vmem:[%s1347_s0 + $0x20] sm:$0xff] (!%p851_p5)  ;;  %v241_v16 = vld [vmem:[%s1347_s0 + $0x30] sm:$0xff] (!%p851_p5)  ;;  %v242_v17 = vld [vmem:[%s1347_s0 + $0x38] sm:$0xff] (!%p851_p5) }
  0x1c   : > { %v956_v15 = vpack.c.bf16 (!%p851_p5), %v240_v14, %v239_v13  ;;  %v962_v18 = vpack.c.bf16 (!%p851_p5), %v242_v17, %v241_v16  ;;  %v243_v19 = vld [vmem:[%s1347_s0 + $0x40] sm:$0xff] (!%p851_p5)  ;;  %v244_v20 = vld [vmem:[%s1347_s0 + $0x48] sm:$0xff] (!%p851_p5)  ;;  %v245_v22 = vld [vmem:[%s1347_s0 + $0x50] sm:$0xff] (!%p851_p5)  ;;  %vm392_vm3 = vcmp.lt.s32.totalorder (!%p851_p5), %v391_v32, 96 }
  0x1d   : > { %946 = vmatprep.subr.msk.bf16.mxu0 (!%p851_p5), %vm1208_vm2, %v944_v9  ;;  %v968_v21 = vpack.c.bf16 (!%p851_p5), %v244_v20, %v243_v19  ;;  %v246_v23 = vld [vmem:[%s1347_s0 + $0x58] sm:$0xff] (!%p851_p5)  ;;  %v247_v25 = vld [vmem:[%s1347_s0 + $0x60] sm:$0xff] (!%p851_p5)  ;;  %v248_v26 = vld [vmem:[%s1347_s0 + $0x68] sm:$0xff] (!%p851_p5) }
  0x1e   : > { %949 = vmatpush3.bf16.xpose.msk.msra.mxu0 (!%p851_p5), %vm1208_vm2, %v944_v9  ;;  %v974_v24 = vpack.c.bf16 (!%p851_p5), %v246_v23, %v245_v22  ;;  %v980_v27 = vpack.c.bf16 (!%p851_p5), %v248_v26, %v247_v25  ;;  %v249_v28 = vld [vmem:[%s1347_s0 + $0x70] sm:$0xff] (!%p851_p5)  ;;  %v250_v29 = vld [vmem:[%s1347_s0 + $0x78] sm:$0xff] (!%p851_p5)  ;;  %v397_v42 = vld [vmem:[#allocation3] sm:$0xff] (!%p851_p5) }
  0x1f   : > { %952 = vmatprep.subr.msk.bf16.mxu0 (!%p851_p5), %vm1208_vm2, %v950_v12  ;;  %v986_v30 = vpack.c.bf16 (!%p851_p5), %v250_v29, %v249_v28  ;;  %v408_v44 = vld [vmem:[#allocation4] sm:$0xff] (!%p851_p5)  ;;  %v398_v47 = vld [vmem:[#allocation3 + $0x8] sm:$0xff] (!%p851_p5)  ;;  %v409_v50 = vld [vmem:[#allocation4 + $0x8] sm:$0xff] (!%p851_p5) }
  0x26   : > { %955 = vmatpush3.bf16.xpose.msk.msra.mxu0 %vm1208_vm2, %v950_v12 }
  0x27   : > { %958 = vmatprep.subr.msk.bf16.mxu0 %vm1208_vm2, %v956_v15 }
  0x2e   : > { %961 = vmatpush3.bf16.xpose.msk.msra.mxu0 %vm1208_vm2, %v956_v15 }
  0x2f   : > { %964 = vmatprep.subr.msk.bf16.mxu0 %vm1208_vm2, %v962_v18 }
  0x36   : > { %967 = vmatpush3.bf16.xpose.msk.msra.mxu0 %vm1208_vm2, %v962_v18 }
  0x37   : > { %970 = vmatprep.subr.msk.bf16.mxu0 %vm1208_vm2, %v968_v21 }
  0x3e   : > { %973 = vmatpush3.bf16.xpose.msk.msra.mxu0 %vm1208_vm2, %v968_v21 }
  0x3f   : > { %976 = vmatprep.subr.msk.bf16.mxu0 %vm1208_vm2, %v974_v24 }
  0x46   : > { %979 = vmatpush3.bf16.xpose.msk.msra.mxu0 %vm1208_vm2, %v974_v24 }
  0x47   : > { %982 = vmatprep.subr.msk.bf16.mxu0 %vm1208_vm2, %v980_v27 }
  0x4e   : > { %985 = vmatpush3.bf16.xpose.msk.msra.mxu0 %vm1208_vm2, %v980_v27 }
  0x4f   : > { %988 = vmatprep.subr.msk.bf16.mxu0 %vm1208_vm2, %v986_v30 }
  0x56   : > { %991 = vmatpush3.bf16.xpose.msk.msra.mxu0 %vm1208_vm2, %v986_v30 }
  0x5d   : > { %935 = vmatmul.mubr.msk.f32.vlgmr.msra.gmra.mrb[0].mxu0 %vm251_vm1, %v1179_v2 }
 0x130   : > { %v936_v33 = vpop.f32.mrb[0].mxu0 }
 0x131   : > { %v372_v34 = vpop.f32.mrb[1].mxu0 }
 0x132   : > { %v381_v35 = vpack.c.bf16 %v936_v33, %v372_v34 }
 0x134   : > { %384 = vst [vmem:[#allocation2] sm:$0xff] %v381_v35  ;;  %v385_v36 = vunpack.c.l.bf16 %v381_v35  ;;  %v386_v37 = vunpack.c.h.bf16 %v381_v35 }
 0x136   : > { %v395_v38 = vsel %vm392_vm3, %v385_v36, 0.0  ;;  %v396_v40 = vsel %vm392_vm3, %v386_v37, 0.0 }
 0x137   : > { %399 = vadd.xlane.f32.xlu0 %v395_v38  ;;  %v410_v39 = vmul.f32 %v395_v38, %v395_v38  ;;  %v411_v41 = vmul.f32 %v396_v40, %v396_v40 }
 0x139   : > { %412 = vadd.xlane.f32.xlu1 %v410_v39 }
 0x13b   : > { %401 = vadd.xlane.f32.xlu0 %v396_v40 }
 0x13d   : > { %414 = vadd.xlane.f32.xlu1 %v411_v41 }
 0x1c4   : > { %v400_v43 = vpop.xlane.xlu0 %399 }
 0x1c5   : > { %v403_v45 = vadd.f32 %v400_v43, %v397_v42 }
 0x1c6   : > { %v413_v46 = vpop.xlane.xlu1 %412 }
 0x1c7   : > { %406 = vst.msk [vmem:[#allocation3] sm:$0xff] %vm405_vm4, %v403_v45  ;;  %v416_v48 = vadd.f32 %v413_v46, %v408_v44 }
 0x1c8   : > { %v402_v49 = vpop.xlane.xlu0 %401 }
 0x1c9   : > { %418 = vst.msk [vmem:[#allocation4] sm:$0xff] %vm405_vm4, %v416_v48  ;;  %v404_v51 = vadd.f32 %v402_v49, %v398_v47 }
 0x1ca   : > { %v415_v52 = vpop.xlane.xlu1 %414 }
 0x1cb   : > { %407 = vst.msk [vmem:[#allocation3 + $0x8] sm:$0xff] %vm405_vm4, %v404_v51  ;;  %v417_v53 = vadd.f32 %v415_v52, %v409_v50 }
 0x1cd   : > { %419 = vst.msk [vmem:[#allocation4 + $0x8] sm:$0xff] %vm405_vm4, %v417_v53 }
 0x1ce PF: > { %p870_p6 = scmp.lt.s32.totalorder %s1105_s12, 1 }
 0x1cf   : > { %v456_v54 = vld [vmem:[#allocation3] sm:$0xff] (!%p870_p6)  ;;  %v1116_v60 = vmov (!%p870_p6), 0   ;;  %v1117_v10 = vmov (!%p870_p6), 1   ;;  %s1118_s18 = smov (!%p870_p6), 1   ;;  %s1119_s19 = smov (!%p870_p6), 96   ;;  %v453_v22 = vld [vmem:[#allocation2] sm:$0xff] (!%p870_p6) }
 0x1d0   : > { %450 = sbr.rel (%p870_p6) target bundleno = 1639 (0x667), region = 52  ;;  %v460_v55 = vld [vmem:[#allocation4] sm:$0xff] (!%p870_p6)  ;;  %v458_v57 = vmul.f32 (!%p870_p6), 0.010416667, %v456_v54  ;;  %1044 = vset.pattern.permute.xlu1 (!%p870_p6), %v1116_v60  ;;  %1045 = vset.pattern.permute.xlu0 (!%p870_p6), %v1117_v10  ;;  %v454_v23 = vunpack.c.l.bf16 (!%p870_p6), %v453_v22  ;;  %v455_v24 = vunpack.c.h.bf16 (!%p870_p6), %v453_v22  ;;  %vm518_vm5 = vcmask (!%p870_p6), 130048   ;;  %p873_p7 = scmp.ne.s32.totalorder (!%p870_p6), %s1105_s12, 1 }
 0x1d1   : > { %v462_v58 = vmul.f32 (!%p870_p6), 0.010416667, %v460_v55 }
 0x1d2   : > { %v457_v56 = vld [vmem:[#allocation3 + $0x8] sm:$0xff] (!%p870_p6)  ;;  %v464_v62 = vmul.f32 (!%p870_p6), %v458_v57, %v458_v57 }
 0x1d3   : > { %v459_v59 = vmul.f32 (!%p870_p6), 0.010416667, %v457_v56 }
 0x1d4   : > { %v461_v61 = vld [vmem:[#allocation4 + $0x8] sm:$0xff] (!%p870_p6)  ;;  %v466_v6 = vsub.f32 (!%p870_p6), %v462_v58, %v464_v62 }
 0x1d5   : > { %v463_v63 = vmul.f32 (!%p870_p6), 0.010416667, %v461_v61  ;;  %v465_v0 = vmul.f32 (!%p870_p6), %v459_v59, %v459_v59 }
 0x1d6   : > { %v468_v8 = vadd.f32 (!%p870_p6), 1e-05, %v466_v6 }
 0x1d7   : > { %v467_v7 = vsub.f32 %v463_v63, %v465_v0  ;;  %v605_v37 = vlaneseq (!%p873_p7)  ;;  %v612_v43 = vld [vmem:[#allocation5] sm:$0xff] (!%p873_p7)  ;;  %vm620_vm7 = vcmask (!%p873_p7), 7168   ;;  %v623_v45 = vld [vmem:[#allocation6] sm:$0xff] (!%p873_p7)  ;;  %v613_v48 = vld [vmem:[#allocation5 + $0x8] sm:$0xff] (!%p873_p7) }
 0x1d8   : > { %1047 = vrsqrt.f32 %v468_v8  ;;  %v624_v51 = vld [vmem:[#allocation6 + $0x8] sm:$0xff] (!%p873_p7) }
 0x1d9   : > { %v469_v9 = vadd.f32 1e-05, %v467_v7  ;;  %v606_v38 = vand.u32 (!%p873_p7), 127, %v605_v37 }
 0x1db   : > { %1049 = vrsqrt.f32 %v469_v9  ;;  %vm607_vm6 = vcmp.lt.s32.totalorder (!%p873_p7), %v606_v38, 96 }
 0x1e2   : > { %v1048_v11 = vpop.eup %1047 }
 0x1e3   : > { %v472_v13 = vmul.f32 %v1048_v11, %v1184_v3 }
 0x1e5   : > { %v1050_v12 = vpop.eup %1049  ;;  %v474_v15 = vmul.f32 %v472_v13, %v458_v57  ;;  %488 = vperm.xlu1 %1044, %v472_v13  }
 0x1e6   : > { %v473_v14 = vmul.f32 %v1050_v12, %v1189_v4 }
 0x1e7   : > { %478 = vrot.lane.b32.xlu0 %v474_v15, %s1118_s18 }
 0x1e8   : > { %v475_v16 = vmul.f32 %v473_v14, %v459_v59 }
 0x1e9   : > { %493 = vperm.xlu1 %1044, %v473_v14  }
 0x1eb   : > { %480 = vrot.lane.b32.xlu0 %v475_v16, %s1118_s18 }
 0x1ed   : > { %1046 = vset.pattern.permute.xlu1 %v1117_v10 }
 0x259   : > { %v479_v17 = vpop.permute.xlu0 %478 }
 0x25a   : > { %v484_v18 = vsub.f32 %v1184_v3, %v479_v17 }
 0x25c   : > { %500 = vperm.xlu0 %1045, %v484_v18  }
 0x25d   : > { %v481_v19 = vpop.permute.xlu0 %480 }
 0x25e   : > { %v485_v20 = vsub.f32 %v1189_v4, %v481_v19 }
 0x260   : > { %505 = vperm.xlu1 %1046, %v485_v20   ;;  %516 = vrot.lane.b32.xlu0 %v1179_v2, %s1119_s19 }
 0x264   : > { %514 = vrot.lane.b32.xlu1 %v1174_v1, %s1119_s19  ;;  %v489_v21 = vpop.permute.xlu1 %488 }
 0x265   : > { %v496_v27 = vmul.f32 %v489_v21, %v454_v23 }
 0x268   : > { %v494_v25 = vpop.permute.xlu1 %493 }
 0x269   : > { %v497_v28 = vmul.f32 %v494_v25, %v455_v24 }
 0x2db   : > { %v501_v26 = vpop.permute.xlu0 %500 }
 0x2dc   : > { %v508_v29 = vadd.f32 %v501_v26, %v496_v27 }
 0x2de   : > { %v510_v32 = vmax.f32 %v508_v29, 0.0 }
 0x2df   : > { %v506_v30 = vpop.permute.xlu1 %505  ;;  %v517_v1 = vpop.permute.xlu0 %516 }
 0x2e0   : > { %v509_v31 = vadd.f32 %v506_v30, %v497_v28 }
 0x2e2   : > { %v511_v33 = vmax.f32 %v509_v31, 0.0 }
 0x2e3   : > { %v515_v34 = vpop.permute.xlu1 %514 }
 0x2e4   : > { %v992_v35 = vpack.c.bf16 %v511_v33, %v510_v32  ;;  %941 = vmatprep.mubr.msk.f32.mxu0 %vm518_vm5, %v515_v34 }
 0x2e6   : > { %993 = vmatprep.subr.bf16.mxu0 %v992_v35 }
 0x2e7   : > { %995 = vmatpush3.bf16.msra.mxu0 %v992_v35 }
 0x2ea   : > { %942 = vmatmul.mubr.msk.f32.vlgmr.msra.gmra.mrb[0].mxu0 %vm518_vm5, %v517_v1 }
 0x3b8   : > { %601 = sbr.rel (%p873_p7) target bundleno = 1111 (0x457), region = 56 }
 0x3bd   : > { %v1294_v2 = vpop.f32.mrb[0].mxu0 }
 0x3be   : > { %v1296_v36 = vpop.f32.mrb[1].mxu0  ;;  %v611_v40 = vsel (!%p873_p7), %vm607_vm6, %v1294_v2, 0.0 }
 0x3bf   : > { %v610_v39 = vsel %vm607_vm6, %v1296_v36, 0.0  ;;  %v626_v42 = vmul.f32 %v611_v40, %v611_v40 }
 0x3c0   : > { %614 = vadd.xlane.f32.xlu0 %v610_v39  ;;  %v625_v41 = vmul.f32 %v610_v39, %v610_v39 }
 0x3c2   : > { %627 = vadd.xlane.f32.xlu1 %v625_v41 }
 0x3c4   : > { %616 = vadd.xlane.f32.xlu0 %v611_v40 }
 0x3c6   : > { %629 = vadd.xlane.f32.xlu1 %v626_v42 }
 0x44d   : > { %v615_v44 = vpop.xlane.xlu0 %614 }
 0x44e   : > { %v618_v46 = vadd.f32 %v615_v44, %v612_v43 }
 0x44f   : > { %v628_v47 = vpop.xlane.xlu1 %627 }
 0x450   : > { %621 = vst.msk [vmem:[#allocation5] sm:$0xff] %vm620_vm7, %v618_v46  ;;  %v631_v49 = vadd.f32 %v628_v47, %v623_v45 }
 0x451   : > { %v617_v50 = vpop.xlane.xlu0 %616 }
 0x452   : > { %633 = vst.msk [vmem:[#allocation6] sm:$0xff] %vm620_vm7, %v631_v49  ;;  %v619_v52 = vadd.f32 %v617_v50, %v613_v48 }
 0x453   : > { %v630_v53 = vpop.xlane.xlu1 %629 }
 0x454   : > { %622 = vst.msk [vmem:[#allocation5 + $0x8] sm:$0xff] %vm620_vm7, %v619_v52  ;;  %v632_v54 = vadd.f32 %v630_v53, %v624_v51 }
 0x456   : > { %634 = vst.msk [vmem:[#allocation6 + $0x8] sm:$0xff] %vm620_vm7, %v632_v54 }
 0x457 PF: > { %p874_p8 = scmp.ne.s32.totalorder %s1105_s12, 2 }
 0x458   : > { %v666_v55 = vld [vmem:[#allocation5] sm:$0xff] (!%p874_p8)  ;;  %s1120_s20 = smov (!%p874_p8), 2   ;;  %v1121_v12 = vmov (!%p874_p8), 2   ;;  %s1122_s12 = smov (!%p874_p8), 126   ;;  %v1124_v21 = vmov (!%p874_p8), 3   ;;  %v1125_v26 = vmov (!%p874_p8), 4  }
 0x459   : > { %665 = sbr.rel (%p874_p8) target bundleno = 1639 (0x667), region = 68  ;;  %v670_v56 = vld [vmem:[#allocation6] sm:$0xff] (!%p874_p8)  ;;  %v668_v58 = vmul.f32 (!%p874_p8), 0.010416667, %v666_v55  ;;  %1051 = vset.pattern.permute.xlu0 (!%p874_p8), %v1121_v12  ;;  %1052 = vset.pattern.permute.xlu1 (!%p874_p8), %v1121_v12  ;;  %s1123_s21 = smov (!%p874_p8), 3   ;;  %v1126_v27 = vmov (!%p874_p8), 5  }
 0x45a   : > { %v672_v59 = vmul.f32 (!%p874_p8), 0.010416667, %v670_v56 }
 0x45b   : > { %v667_v57 = vld [vmem:[#allocation5 + $0x8] sm:$0xff] (!%p874_p8)  ;;  %v674_v62 = vmul.f32 (!%p874_p8), %v668_v58, %v668_v58 }
 0x45c   : > { %v669_v60 = vmul.f32 (!%p874_p8), 0.010416667, %v667_v57 }
 0x45d   : > { %v671_v61 = vld [vmem:[#allocation6 + $0x8] sm:$0xff] (!%p874_p8)  ;;  %v676_v6 = vsub.f32 (!%p874_p8), %v672_v59, %v674_v62 }
 0x45e   : > { %v673_v63 = vmul.f32 (!%p874_p8), 0.010416667, %v671_v61  ;;  %v675_v0 = vmul.f32 (!%p874_p8), %v669_v60, %v669_v60 }
 0x45f   : > { %v678_v8 = vadd.f32 (!%p874_p8), 1e-05, %v676_v6 }
 0x460   : > { %v677_v7 = vsub.f32 %v673_v63, %v675_v0 }
 0x461   : > { %1057 = vrsqrt.f32 %v678_v8 }
 0x462   : > { %v679_v9 = vadd.f32 1e-05, %v677_v7 }
 0x464   : > { %1059 = vrsqrt.f32 %v679_v9 }
 0x46b   : > { %v1058_v10 = vpop.eup %1057 }
 0x46c   : > { %684 = vrot.lane.b32.xlu0 %v1058_v10, %s1120_s20 }
 0x46e   : > { %v1060_v11 = vpop.eup %1059 }
 0x470   : > { %686 = vrot.lane.b32.xlu0 %v1060_v11, %s1120_s20 }
 0x4de   : > { %v685_v13 = vpop.permute.xlu0 %684 }
 0x4df   : > { %v690_v14 = vmul.f32 %v685_v13, %v1184_v3 }
 0x4e1   : > { %694 = vrot.lane.b32.xlu1 %v690_v14, %s1122_s12 }
 0x4e2   : > { %v687_v15 = vpop.permute.xlu0 %686 }
 0x4e3   : > { %v691_v16 = vmul.f32 %v687_v15, %v1189_v4 }
 0x4e5   : > { %696 = vrot.lane.b32.xlu1 %v691_v16, %s1122_s12 }
 0x553   : > { %v695_v17 = vpop.permute.xlu1 %694 }
 0x554   : > { %v700_v18 = vmul.f32 %v695_v17, %v668_v58 }
 0x556   : > { %704 = vrot.lane.b32.xlu0 %v700_v18, %s1123_s21 }
 0x557   : > { %v697_v19 = vpop.permute.xlu1 %696 }
 0x558   : > { %v701_v20 = vmul.f32 %v697_v19, %v669_v60 }
 0x55a   : > { %713 = vperm.xlu0 %1051, %v690_v14   ;;  %706 = vrot.lane.b32.xlu1 %v701_v20, %s1123_s21 }
 0x55e   : > { %717 = vperm.xlu1 %1052, %v691_v16   ;;  %1054 = vset.pattern.permute.xlu0 %v1124_v21 }
 0x562   : > { %1053 = vset.pattern.permute.xlu1 %v1124_v21 }
 0x5c8   : > { %v705_v22 = vpop.permute.xlu0 %704 }
 0x5c9   : > { %v710_v23 = vsub.f32 %v1184_v3, %v705_v22 }
 0x5cb   : > { %724 = vperm.xlu1 %1053, %v710_v23  }
 0x5cc   : > { %v707_v24 = vpop.permute.xlu1 %706 }
 0x5cd   : > { %v711_v25 = vsub.f32 %v1189_v4, %v707_v24 }
 0x5cf   : > { %729 = vperm.xlu0 %1054, %v711_v25   ;;  %1055 = vset.pattern.permute.xlu1 %v1125_v26 }
 0x5d0   : > { %738 = vperm.xlu1 %1055, %v1184_v3  }
 0x5d3   : > { %1056 = vset.pattern.permute.xlu0 %v1126_v27 }
 0x5d4   : > { %743 = vperm.xlu1 %1055, %v1189_v4   ;;  %757 = vperm.xlu0 %1056, %v1194_v5  }
 0x5d9   : > { %v714_v29 = vpop.permute.xlu0 %713 }
 0x5da   : > { %v720_v30 = vmul.f32 %v714_v29, %v1296_v36 }
 0x5dd   : > { %v718_v28 = vpop.permute.xlu1 %717 }
 0x5de   : > { %v721_v33 = vmul.f32 %v1294_v2, %v718_v28 }
 0x64a   : > { %v725_v31 = vpop.permute.xlu1 %724 }
 0x64b   : > { %v732_v32 = vadd.f32 %v725_v31, %v720_v30 }
 0x64d   : > { %v734_v37 = vmax.f32 %v732_v32, 0.0 }
 0x64e   : > { %v730_v34 = vpop.permute.xlu0 %729 }
 0x64f   : > { %v733_v35 = vadd.f32 %v730_v34, %v721_v33  ;;  %v739_v1 = vpop.permute.xlu1 %738 }
 0x650   : > { %v746_v39 = vmul.f32 %v739_v1, %v734_v37 }
 0x651   : > { %v735_v38 = vmax.f32 %v733_v35, 0.0 }
 0x653   : > { %v744_v3 = vpop.permute.xlu1 %743  ;;  %v758_v45 = vpop.permute.xlu0 %757 }
 0x654   : > { %v747_v40 = vmul.f32 %v744_v3, %v735_v38 }
 0x656   : > { %v748_v41 = vadd.f32 %v747_v40, %v746_v39 }
 0x658   : > { %v749_v4 = vrot.slane %v748_v41, 4 }
 0x65a   : > { %v750_v42 = vadd.f32 %v749_v4, %v748_v41 }
 0x65c   : > { %v751_v5 = vrot.slane %v750_v42, 2 }
 0x65e   : > { %v752_v43 = vadd.f32 %v751_v5, %v750_v42 }
 0x660   : > { %v753_v44 = vrot.slane %v752_v43, 1 }
 0x662   : > { %v754_v36 = vadd.f32 %v753_v44, %v752_v43 }
 0x664   : > { %v760_v46 = vadd.f32 %v758_v45, %v754_v36 }
 0x666   : > { %761 = vst [vmem:[#allocation7] sm:$0x1] %v760_v46 }
 0x667 PF: > { %p1313_p9 = scmp.eq.s32.totalorder %s844_s15, 2  ;;  %s1127_s23 = smov [#allocation7]  }
 0x668   : > { %s777_s24 = sshll.u32 %s1127_s23, 4  ;;  %s778_s24 = int_to_ptr.vmem [resolvable:$true] %s777_s24 }
 0x669   : > { %s1061_s25 = scalar_lea.vmem %s778_s24, 16  ;;  %s1067_s26 = scalar_lea.vmem %s778_s24, 32 }
 0x66a   : > { %p1062_p10 = scmp.ne.s32.totalorder %s778_s24, %s1061_s25  ;;  %p1068_p13 = scmp.lt.s32.totalorder %s778_s24, %s778_s24 }
 0x66b   : > { %p1069_p0 = scmp.lt.s32.totalorder %s1067_s26, %s1061_s25 }
 0x66c   : > { %p1063_p11 = pnand %p1062_p10, %p1313_p9 }
 0x66d   : > { %p1070_p1 = por %p1069_p0, %p1068_p13 }
 0x66e   : > { %p1064_p12 = pneg %p1063_p11 }
 0x670   : > { %p1071_p2 = pnand %p1070_p1, %p1064_p12 }
 0x672   : > { %1074 = shalt.err (!%p1071_p2)
}
 0x673   : > { %s1075_s28 = scalar_lea.hbm %s1350_s3, 16 }
 0x674   : > { %p1076_p3 = scmp.ne.s32.totalorder %s1350_s3, %s1075_s28  ;;  %p1081_p6 = scmp.lt.u32.totalorder %s1075_s28, %s1350_s3 }
 0x676   : > { %p1077_p4 = pnand %p1076_p3, %p1313_p9 }
 0x678   : > { %p1078_p5 = pneg %p1077_p4 }
 0x67a   : > { %p1083_p7 = pnand %p1081_p6, %p1078_p5 }
 0x67c   : > { %1086 = shalt.err (!%p1083_p7)
}
 0x67d   : > { %997 = dma.vmem_to_hbm [thread:$0]  (%p1313_p9), %s778_s24, 16, %s1350_s3, [#allocation8]  }
 0x67e PF: > { %p1005_p8 = scmp.ge.s32.totalorder %s1113_s14, 2  ;;  %p1006_p10 = scmp.eq.s32.totalorder %s845_s16, 2 }
 0x680   : > { %p1001_p11 = pnand %p1006_p10, %p1005_p8 }
 0x682   : > { %1100 = dma.done.wait (!%p1001_p11), [#allocation8], 16  }
 0x683   : > { %1102 = vsyncadd (!%p1001_p11), [#allocation8], 4294967280  ;;  %s16_s14 = sadd.s32 1, %s1113_s14   ;;  %s1354_s12 = smov %s1109_s13 }
 0x684   : > { %p13_p12 = scmp.ge.s32.totalorder %s16_s14, 5   ;;  %s1355_s13 = smov %s1357_s17 }
 0x686   :  { %15 = sbr.rel (!%p13_p12) target bundleno = 3 (0x3), region = 105 }
 0x68d   :  { %794 = vsyncpa [#allocation8], 1 }
 0x68e   :  { %796 = vsyncpa [#allocation8 + $0x1], 1 }

</bundles_post_ra>
